<compile_context>
chip_gen: v6e
topology: v6e:2x2x1
jax: 0.10.0
libtpu: 0.0.40
codegen_flags: <defaults>
</compile_context>

<pallas_src>
import functools

import numpy as np
import jax
import jax.numpy as jnp
from jax import lax
from jax.experimental import pallas as pl
from jax.experimental.pallas import tpu as pltpu


def _residual_block_kernel(seed_ref, x_ref, sub_ref, gamma_ref, beta_ref, o_ref,
                           *, keep_threshold, inv_keep, inv_h, eps, use_dropout):
    """Fused residual-add + (optional) dropout + LayerNorm over the last dim."""
    x = x_ref[...].astype(jnp.float32)
    sub = sub_ref[...].astype(jnp.float32)

    if use_dropout:
        # Inverted dropout (nn.Dropout training semantics).  Integer-threshold
        # compare on raw bits: P(bits >= t) = 1 - p  with t = round(p * 2^32).
        # NOTE: mask depends on the grid step (tiling), like any stateful PRNG.
        pltpu.prng_seed(seed_ref[0] + pl.program_id(0))
        bits = pltpu.bitcast(pltpu.prng_random_bits(sub.shape), jnp.uint32)
        keep = bits >= np.uint32(keep_threshold)
        sub = jnp.where(keep, sub * inv_keep, 0.0)

    y = x + sub

    # Single-pass statistics over the (zero-padded) lane axis.  Padded lanes
    # contribute zero to both sums; divide by the *true* hidden size.
    row_sum = jnp.sum(y, axis=-1, keepdims=True)
    row_sumsq = jnp.sum(y * y, axis=-1, keepdims=True)
    mean = row_sum * inv_h
    var = row_sumsq * inv_h - mean * mean
    inv = lax.rsqrt(var + eps)

    gamma = gamma_ref[...].astype(jnp.float32)
    beta = beta_ref[...].astype(jnp.float32)
    o_ref[...] = ((y - mean) * inv * gamma + beta).astype(o_ref.dtype)


def _round_up(a, m):
    return ((a + m - 1) // m) * m


def residual_block(x, sublayer_output, gamma, beta, *, p=0.1, eps=1e-5,
                   training=False, seed=0, block_rows=None):
    """Pallas implementation of ResidualBlock.forward.

    x, sublayer_output: (..., H)   (any leading dims, e.g. (B, S, H))
    gamma, beta:        (H,)       (nn.LayerNorm weight / bias)
    training=False reproduces eval-mode (dropout == identity) exactly.
    """
    orig_shape = x.shape
    H = orig_shape[-1]
    N = 1
    for d in orig_shape[:-1]:
        N *= d

    x2 = x.reshape(N, H)
    s2 = sublayer_output.reshape(N, H)

    # ---- layout / tiling ----------------------------------------------------
    Hp = max(128, _round_up(H, 128))                 # lane-dense hidden dim
    itemsize = jnp.dtype(x.dtype).itemsize
    row_mult = 8 if itemsize >= 4 else 16            # f32 vs bf16 sublane pack

    if block_rows is None:
        # Memory-bound kernel: ~512-row tiles pipeline well.  Cap by a
        # conservative VMEM budget: (2 in + 1 out) * double-buffer * f32.
        budget_bytes = 8 * 1024 * 1024
        max_rows = max(row_mult, budget_bytes // (6 * Hp * 4))
        block_rows = min(512, max_rows)
    # Never tile larger than the (row-aligned) problem, and keep sublane align.
    block_rows = min(block_rows, _round_up(N, row_mult))
    block_rows = max(row_mult, (block_rows // row_mult) * row_mult)

    Np = _round_up(N, block_rows)
    grid = (Np // block_rows,)

    # ---- padding (zeros are benign: sums unchanged, rows/lanes sliced off) --
    if Np != N or Hp != H:
        x2 = jnp.pad(x2, ((0, Np - N), (0, Hp - H)))
        s2 = jnp.pad(s2, ((0, Np - N), (0, Hp - H)))
    g2 = gamma.reshape(1, H)
    b2 = beta.reshape(1, H)
    if Hp != H:
        g2 = jnp.pad(g2, ((0, 0), (0, Hp - H)))
        b2 = jnp.pad(b2, ((0, 0), (0, Hp - H)))

    # ---- dropout constants (compile-time) ------------------------------------
    use_dropout = bool(training) and float(p) > 0.0
    keep_threshold = min((1 << 32) - 1, int(round(float(p) * (1 << 32)))) if use_dropout else 0
    inv_keep = (1.0 / (1.0 - float(p))) if use_dropout else 1.0

    kernel = functools.partial(
        _residual_block_kernel,
        keep_threshold=keep_threshold,
        inv_keep=float(inv_keep),
        inv_h=1.0 / float(H),
        eps=float(eps),
        use_dropout=use_dropout,
    )

    seed_arr = jnp.asarray([seed], dtype=jnp.int32)

    out = pl.pallas_call(
        kernel,
        out_shape=jax.ShapeDtypeStruct((Np, Hp), x.dtype),
        grid_spec=pl.GridSpec(
            grid=grid,
            in_specs=[
                pl.BlockSpec(memory_space=pltpu.MemorySpace.SMEM),     # seed
                pl.BlockSpec((block_rows, Hp), lambda i: (i, 0)),      # x
                pl.BlockSpec((block_rows, Hp), lambda i: (i, 0)),      # sublayer
                pl.BlockSpec((1, Hp), lambda i: (0, 0)),               # gamma
                pl.BlockSpec((1, Hp), lambda i: (0, 0)),               # beta
            ],
            out_specs=pl.BlockSpec((block_rows, Hp), lambda i: (i, 0)),
        ),
        compiler_params=pltpu.CompilerParams(
            dimension_semantics=("parallel",)),   # rows independent -> megacore
    )(seed_arr, x2, s2, g2, b2)

    return out[:N, :H].reshape(orig_shape)


def _reference(x, sub, gamma, beta, eps=1e-5):
    """Plain-JAX eval-mode reference (dropout == identity)."""
    y = (x + sub).astype(jnp.float32)
    mean = jnp.mean(y, axis=-1, keepdims=True)
    var = jnp.mean((y - mean) ** 2, axis=-1, keepdims=True)
    return ((y - mean) / jnp.sqrt(var + eps)) * gamma + beta


if __name__ == "__main__":
    key = jax.random.PRNGKey(0)
    k1, k2, k3, k4 = jax.random.split(key, 4)

    # --- small demo shape consistent with the module: batch=2, seq=8, hidden=32
    B, S, H = 2, 8, 32
    x = jax.random.normal(k1, (B, S, H), dtype=jnp.float32)
    sublayer_output = jax.random.normal(k2, (B, S, H), dtype=jnp.float32)
    gamma = jnp.ones((H,), dtype=jnp.float32)   # nn.LayerNorm default init
    beta = jnp.zeros((H,), dtype=jnp.float32)

    out = residual_block(x, sublayer_output, gamma, beta, p=0.1, training=False)
    out = jax.block_until_ready(out)
    ref = _reference(x, sublayer_output, gamma, beta)
    assert out.shape == (B, S, H)
    assert jnp.allclose(out, ref, atol=1e-5, rtol=1e-5)

    # --- second (still small) shape exercising row tiling + multi-step grid
    B2, S2, H2 = 4, 256, 256
    xb = jax.random.normal(k3, (B2, S2, H2), dtype=jnp.float32)
    sb = jax.random.normal(k4, (B2, S2, H2), dtype=jnp.float32)
    g2 = jnp.ones((H2,), dtype=jnp.float32)
    b2 = jnp.zeros((H2,), dtype=jnp.float32)
    out2 = residual_block(xb, sb, g2, b2, p=0.1, training=False)
    out2 = jax.block_until_ready(out2)
    ref2 = _reference(xb, sb, g2, b2)
    assert jnp.allclose(out2, ref2, atol=1e-4, rtol=1e-4)

    # TODO(synk): training-mode dropout (pltpu.prng_*) is implemented but not
    # exercised here because the PRNG primitives do not lower in CPU-interpret
    # sandboxes; on real TPU call residual_block(..., training=True, seed=...).

    print("KERNEL_OK")
</pallas_src>

<mosaic_0001>
module attributes {stable_mosaic.version = 11 : i64} {
  func.func @_residual_block_kernel(%arg0: i32, %arg1: memref<1xi32, #tpu.memory_space<smem>>, %arg2: memref<16x128xf32, #tpu.memory_space<vmem>>, %arg3: memref<16x128xf32, #tpu.memory_space<vmem>>, %arg4: memref<1x128xf32, #tpu.memory_space<vmem>>, %arg5: memref<1x128xf32, #tpu.memory_space<vmem>>, %arg6: memref<16x128xf32, #tpu.memory_space<vmem>>) attributes {dimension_semantics = [#tpu.dimension_semantics<parallel>], iteration_bounds = array<i64: 1>, scalar_prefetch = 0 : i64, scratch_operands = 0 : i64, tpu.core_type = #tpu.core_type<tc>, window_params = [{transform_indices = @transform_0, window_bounds = array<i64: 1>}, {transform_indices = @transform_1, window_bounds = array<i64: 16, 128>}, {transform_indices = @transform_2, window_bounds = array<i64: 16, 128>}, {pipeline_mode = #tpu.pipeline_mode<synchronous>, transform_indices = @transform_3, window_bounds = array<i64: 1, 128>}, {pipeline_mode = #tpu.pipeline_mode<synchronous>, transform_indices = @transform_4, window_bounds = array<i64: 1, 128>}, {transform_indices = @transform_5, window_bounds = array<i64: 16, 128>}]} {
    %c0 = arith.constant 0 : index
    %c0_0 = arith.constant 0 : index
    %0 = vector.load %arg2[%c0, %c0_0] : memref<16x128xf32, #tpu.memory_space<vmem>>, vector<16x128xf32>
    %c0_1 = arith.constant 0 : index
    %c0_2 = arith.constant 0 : index
    %1 = vector.load %arg3[%c0_1, %c0_2] : memref<16x128xf32, #tpu.memory_space<vmem>>, vector<16x128xf32>
    %2 = arith.addf %0, %1 : vector<16x128xf32>
    %cst = arith.constant dense<0.000000e+00> : vector<16xf32>
    %3 = vector.multi_reduction <add>, %2, %cst [1] : vector<16x128xf32> to vector<16xf32>
    %4 = vector.shape_cast %3 : vector<16xf32> to vector<16x1xf32>
    %5 = arith.mulf %2, %2 : vector<16x128xf32>
    %cst_3 = arith.constant dense<0.000000e+00> : vector<16xf32>
    %6 = vector.multi_reduction <add>, %5, %cst_3 [1] : vector<16x128xf32> to vector<16xf32>
    %7 = vector.shape_cast %6 : vector<16xf32> to vector<16x1xf32>
    %cst_4 = arith.constant 3.125000e-02 : f32
    %8 = vector.broadcast %cst_4 : f32 to vector<16x1xf32>
    %9 = arith.mulf %4, %8 : vector<16x1xf32>
    %cst_5 = arith.constant 3.125000e-02 : f32
    %10 = vector.broadcast %cst_5 : f32 to vector<16x1xf32>
    %11 = arith.mulf %7, %10 : vector<16x1xf32>
    %12 = arith.mulf %9, %9 : vector<16x1xf32>
    %13 = arith.subf %11, %12 : vector<16x1xf32>
    %cst_6 = arith.constant 9.99999974E-6 : f32
    %14 = vector.broadcast %cst_6 : f32 to vector<16x1xf32>
    %15 = arith.addf %13, %14 : vector<16x1xf32>
    %16 = math.rsqrt %15 : vector<16x1xf32>
    %c0_7 = arith.constant 0 : index
    %c0_8 = arith.constant 0 : index
    %17 = vector.load %arg4[%c0_7, %c0_8] : memref<1x128xf32, #tpu.memory_space<vmem>>, vector<1x128xf32>
    %c0_9 = arith.constant 0 : index
    %c0_10 = arith.constant 0 : index
    %18 = vector.load %arg5[%c0_9, %c0_10] : memref<1x128xf32, #tpu.memory_space<vmem>>, vector<1x128xf32>
    %19 = vector.broadcast %9 : vector<16x1xf32> to vector<16x128xf32>
    %20 = arith.subf %2, %19 : vector<16x128xf32>
    %21 = vector.broadcast %16 : vector<16x1xf32> to vector<16x128xf32>
    %22 = arith.mulf %20, %21 : vector<16x128xf32>
    %23 = vector.broadcast %17 : vector<1x128xf32> to vector<16x128xf32>
    %24 = arith.mulf %22, %23 : vector<16x128xf32>
    %25 = vector.broadcast %18 : vector<1x128xf32> to vector<16x128xf32>
    %26 = arith.addf %24, %25 : vector<16x128xf32>
    %c0_11 = arith.constant 0 : index
    %c0_12 = arith.constant 0 : index
    %27 = vector.load %arg6[%c0_11, %c0_12] : memref<16x128xf32, #tpu.memory_space<vmem>>, vector<16x128xf32>
    tpu.vector_store %arg6[%c0_11, %c0_12], %26 {strides = array<i32>} : memref<16x128xf32, #tpu.memory_space<vmem>>, vector<16x128xf32>,
    return
  }
  func.func @transform_0(%arg0: i32) -> i32 {
    %c0_i32 = arith.constant 0 : i32
    %c0_i32_0 = arith.constant 0 : i32
    return %c0_i32 : i32
  }
  func.func @transform_1(%arg0: i32) -> (i32, i32) {
    %c0_i32 = arith.constant 0 : i32
    %c0_i32_0 = arith.constant 0 : i32
    return %arg0, %c0_i32 : i32, i32
  }
  func.func @transform_2(%arg0: i32) -> (i32, i32) {
    %c0_i32 = arith.constant 0 : i32
    %c0_i32_0 = arith.constant 0 : i32
    return %arg0, %c0_i32 : i32, i32
  }
  func.func @transform_3(%arg0: i32) -> (i32, i32) {
    %c0_i32 = arith.constant 0 : i32
    %c0_i32_0 = arith.constant 0 : i32
    %c0_i32_1 = arith.constant 0 : i32
    return %c0_i32, %c0_i32_0 : i32, i32
  }
  func.func @transform_4(%arg0: i32) -> (i32, i32) {
    %c0_i32 = arith.constant 0 : i32
    %c0_i32_0 = arith.constant 0 : i32
    %c0_i32_1 = arith.constant 0 : i32
    return %c0_i32, %c0_i32_0 : i32, i32
  }
  func.func @transform_5(%arg0: i32) -> (i32, i32) {
    %c0_i32 = arith.constant 0 : i32
    %c0_i32_0 = arith.constant 0 : i32
    return %arg0, %c0_i32 : i32, i32
  }
}

</mosaic_0001>

<bundles_post_ra>
// kernel: tpu_custom_call.1
= control target key start
LH: loop header
LB: loop body
LE: loop exit
PB: predicated region body
PF: predicated region fallthrough
CT: control target
= control target key end

     0   :  { %11 = vsyncpa [#allocation4], 0  ;;  %s256_s0 = inlined_call_operand.<no memory space> [shape: s32[1], index: 0, kind: input, shape index: {}]   ;;  %s257_s1 = inlined_call_operand.hbm [shape: f32[16,128], index: 1, kind: input, shape index: {}]   ;;  %s258_s2 = inlined_call_operand.hbm [shape: f32[16,128], index: 2, kind: input, shape index: {}]   ;;  %s259_s3 = inlined_call_operand.vmem [shape: f32[1,128], index: 3, kind: input, shape index: {}]   ;;  %s260_s4 = inlined_call_operand.vmem [shape: f32[1,128], index: 4, kind: input, shape index: {}]   ;;  %s261_s5 = inlined_call_operand.hbm [shape: f32[16,128], index: 5, kind: output, shape index: {}]  }
   0x1   :  { %12 = vsyncpa [#allocation7], 0 }
   0x2   :  { %13 = vsyncpa [#allocation5], 0  ;;  %s197_s18 = smov [#allocation3]  }
   0x3   :  { %s21_s0 = sshll.u32 %s197_s18, 4  ;;  %s22_s0 = int_to_ptr.vmem [resolvable:$true] %s21_s0 }
   0x4   :  { %s139_s19 = scalar_lea.vmem %s22_s0, 256  ;;  %p144_p1 = scmp.lt.s32.totalorder %s22_s0, %s22_s0 }
   0x5   :  { %p140_p0 = scmp.ne.s32.totalorder %s22_s0, %s139_s19  ;;  %p145_p2 = scmp.lt.s32.totalorder %s139_s19, %s139_s19 }
   0x7   :  { %p146_p3 = por %p145_p2, %p144_p1 }
   0x9   :  { %p147_p4 = pnand %p146_p3, %p140_p0 }
   0xb   :  { %150 = shalt.err (!%p147_p4)
}
   0xc   :  { %s198_s20 = smov 128   ;;  %s199_s21 = smov 8  }
   0xd   :  { %27 = dma.hbm_to_vmem [thread:$0]  %s257_s1, 256, %s22_s0, [#allocation4], %s198_s20, %s198_s20, %s199_s21  }
   0xe   :  { %s200_s24 = smov [#allocation6]  }
   0xf   :  { %s33_s25 = sshll.u32 %s200_s24, 4  ;;  %s34_s25 = int_to_ptr.vmem [resolvable:$true] %s33_s25 }
  0x10   :  { %s159_s26 = scalar_lea.vmem %s34_s25, 256  ;;  %p164_p6 = scmp.lt.s32.totalorder %s34_s25, %s34_s25 }
  0x11   :  { %p160_p5 = scmp.ne.s32.totalorder %s34_s25, %s159_s26  ;;  %p165_p7 = scmp.lt.s32.totalorder %s159_s26, %s159_s26 }
  0x13   :  { %p166_p8 = por %p165_p7, %p164_p6 }
  0x15   :  { %p167_p9 = pnand %p166_p8, %p160_p5 }
  0x17   :  { %170 = shalt.err (!%p167_p9)
}
  0x18   :  { %39 = dma.hbm_to_vmem [thread:$0]  %s258_s2, 256, %s34_s25, [#allocation7], %s198_s20, %s198_s20, %s199_s21  }
  0x19   :  { %191 = dma.done.wait [#allocation4], 256  }
  0x1a   :  { %192 = vsyncadd [#allocation4], 4294967040 }
  0x1b   :  { %193 = dma.done.wait [#allocation7], 256  }
  0x1c   :  { %194 = vsyncadd [#allocation7], 4294967040  ;;  %v50_v0 = vld [vmem:[#allocation3] sm:$0xff]  ;;  %v52_v1 = vld [vmem:[#allocation6] sm:$0xff]  ;;  %s201_s6 = smov [#allocation8]  }
  0x1d   :  { %v51_v2 = vld [vmem:[#allocation3 + $0x8] sm:$0xff]  ;;  %v54_v3 = vadd.f32 %v52_v1, %v50_v0  ;;  %v53_v4 = vld [vmem:[#allocation6 + $0x8] sm:$0xff]  ;;  %v120_v24 = vld [vmem:[%s259_s3] ss:$0 sm:$0xff]  ;;  %s107_s7 = sshll.u32 %s201_s6, 4  ;;  %s108_s7 = int_to_ptr.vmem [resolvable:$true] %s107_s7 }
  0x1e   :  { %v55_v5 = vadd.f32 %v53_v4, %v51_v2  ;;  %v121_v26 = vld [vmem:[%s260_s4] ss:$0 sm:$0xff]  ;;  %s171_s8 = scalar_lea.vmem %s108_s7, 256  ;;  %p176_p11 = scmp.lt.s32.totalorder %s108_s7, %s108_s7 }
  0x1f   :  { %56 = vadd.xlane.f32.xlu0 %v54_v3  ;;  %v60_v6 = vmul.f32 %v54_v3, %v54_v3  ;;  %p172_p10 = scmp.ne.s32.totalorder %s108_s7, %s171_s8  ;;  %p177_p12 = scmp.lt.s32.totalorder %s171_s8, %s171_s8 }
  0x20   :  { %v61_v7 = vmul.f32 %v55_v5, %v55_v5 }
  0x21   :  { %62 = vadd.xlane.f32.xlu1 %v60_v6  ;;  %p178_p13 = por %p177_p12, %p176_p11 }
  0x23   :  { %58 = vadd.xlane.f32.xlu0 %v55_v5  ;;  %p179_p0 = pnand %p178_p13, %p172_p10 }
  0x25   :  { %64 = vadd.xlane.f32.xlu1 %v61_v7 }
  0xa8   :  { %v57_v8 = vpop.xlane.xlu0 %56 }
  0xa9   :  { %v66_v9 = vmul.f32 0.03125, %v57_v8 }
  0xaa   :  { %v63_v10 = vpop.xlane.xlu1 %62 }
  0xab   :  { %v70_v11 = vmul.f32 %v66_v9, %v66_v9  ;;  %v68_v12 = vmul.f32 0.03125, %v63_v10  ;;  %v80_v22 = vsub.f32 %v54_v3, %v66_v9 }
  0xac   :  { %v59_v13 = vpop.xlane.xlu0 %58 }
  0xad   :  { %v72_v14 = vsub.f32 %v68_v12, %v70_v11  ;;  %v67_v15 = vmul.f32 0.03125, %v59_v13 }
  0xae   :  { %v65_v16 = vpop.xlane.xlu1 %64 }
  0xaf   :  { %v74_v17 = vadd.f32 1e-05, %v72_v14  ;;  %v71_v18 = vmul.f32 %v67_v15, %v67_v15  ;;  %v69_v19 = vmul.f32 0.03125, %v65_v16  ;;  %v81_v27 = vsub.f32 %v55_v5, %v67_v15 }
  0xb1   :  { %127 = vrsqrt.f32 %v74_v17  ;;  %v73_v20 = vsub.f32 %v69_v19, %v71_v18 }
  0xb3   :  { %v75_v21 = vadd.f32 1e-05, %v73_v20 }
  0xb5   :  { %129 = vrsqrt.f32 %v75_v21 }
  0xbe   :  { %v128_v23 = vpop.eup %127 }
  0xbf   :  { %v82_v25 = vmul.f32 %v128_v23, %v80_v22 }
  0xc1   :  { %v90_v28 = vmul.f32 %v120_v24, %v82_v25 }
  0xc2   :  { %v130_v29 = vpop.eup %129 }
  0xc3   :  { %v83_v30 = vmul.f32 %v130_v29, %v81_v27  ;;  %v98_v31 = vadd.f32 %v121_v26, %v90_v28 }
  0xc5   :  { %v91_v32 = vmul.f32 %v120_v24, %v83_v30  ;;  %100 = vst [vmem:[#allocation8] sm:$0xff] %v98_v31 }
  0xc7   :  { %v99_v33 = vadd.f32 %v121_v26, %v91_v32 }
  0xc9   :  { %101 = vst [vmem:[#allocation8 + $0x8] sm:$0xff] %v99_v33 }
  0xca   :  { %182 = shalt.err (!%p179_p0)
}
  0xcb   :  { %113 = dma.vmem_to_hbm [thread:$0]  %s108_s7, 256, %s261_s5, [#allocation5], %s198_s20, %s198_s20, %s199_s21  }
  0xcc   :  { %195 = dma.done.wait [#allocation5], 256  }
  0xcd   :  { %196 = vsyncadd [#allocation5], 4294967040 }
  0xce   :  { %117 = vsyncpa [#allocation4], 1 }
  0xcf   :  { %118 = vsyncpa [#allocation7], 1 }
  0xd0   :  { %119 = vsyncpa [#allocation5], 1 }

</bundles_post_ra>
